<compile_context>
chip_gen: v5e
topology: v5e:2x2
jax: 0.10.0
libtpu: 0.0.40
codegen_flags: <defaults>
</compile_context>

<pallas_src>
import functools

import jax
import jax.numpy as jnp
from jax.experimental import pallas as pl
from jax.experimental.pallas import tpu as pltpu


def _round_up(x, m):
    return ((x + m - 1) // m) * m


def _pick_row_tile(oh, owp, max_m):
    """Largest divisor TH of OH with TH*OWp <= max_m (falls back to 1)."""
    best = 1
    for th_ in range(1, oh + 1):
        if oh % th_ == 0 and th_ * owp <= max_m:
            best = th_
    return best


def _specific_conv2d_kernel(x_ref, w_ref, b_ref, o_ref, *, kh, stride, cout):
    # x_ref: [1, Hp, OWp, KW*Cin]   bf16 KW-packed padded image (one batch element)
    # w_ref: [KH, KW*Cin, CoutP]    bf16 weight, KW taps folded into the K dim
    # b_ref: [1, CoutP]             f32 bias (zero-padded)
    # o_ref: [1, TH, OWp, Cout]     output row tile (compact channel dim)
    _, th, owp, _ = o_ref.shape
    kwcin = x_ref.shape[-1]
    coutp = w_ref.shape[-1]
    m = th * owp

    t = pl.program_id(1)
    row0 = pl.multiple_of(t * (th * stride), th * stride)  # first padded input row

    acc = jnp.zeros((m, coutp), dtype=jnp.float32)
    # KH matmuls with K = KW*Cin (taps folded into the contraction dim), f32 accum.
    for i in range(kh):
        if stride == 1:
            rows = x_ref[0, pl.ds(row0 + i, th), :, :]
        else:
            rows = x_ref[0, pl.ds(row0 + i, th, stride=stride), :, :]
        # (TH, OWp) -> M merge is layout-neutral because OWp % 8 == 0.
        acc = acc + jnp.dot(rows.reshape(m, kwcin), w_ref[i],
                            preferred_element_type=jnp.float32)

    acc = acc + b_ref[...]                                  # f32 epilogue
    # Drop the padded MXU-N lanes before the HBM writeback (no 128-channel inflation).
    o_ref[...] = acc[:, :cout].reshape(1, th, owp, cout).astype(o_ref.dtype)


def specific_conv2d(x_nchw, global_weight, global_weight_atten, specific_weight,
                    specific_bias, *, stride=1, padding=0):
    """Forward pass of SpecificConv2D. Input x_nchw is NCHW (PyTorch convention)."""
    # --- parameter setup (glue, plain JAX): build theta exactly like the module ---
    theta = (jnp.sum(global_weight_atten * global_weight, axis=-1)
             + jnp.squeeze(specific_weight, axis=-1))       # [Cout, Cin, KH, KW] (OIHW)
    cout, cin, kh, kw = theta.shape
    n, c, h, w = x_nchw.shape
    assert c == cin
    out_dtype = x_nchw.dtype
    if specific_bias is None:
        specific_bias = jnp.zeros((cout,), jnp.float32)

    # NCHW -> NHWC, spatial pad.
    x = jnp.transpose(x_nchw, (0, 2, 3, 1))
    x = jnp.pad(x, ((0, 0), (padding, padding), (padding, padding), (0, 0)))
    hp, wp = h + 2 * padding, w + 2 * padding
    oh = (hp - kh) // stride + 1
    ow = (wp - kw) // stride + 1
    owp = _round_up(ow, 8)          # sublane-aligned output width
    kwcin = kw * cin

    # im2col pack along KW (and the width stride): x_pack[n, h, o, j*Cin + c]
    #   = x_padded[n, h, o*stride + j, c].  Cast to bf16 for the MXU.
    parts = [x[:, :, j: j + (ow - 1) * stride + 1: stride, :] for j in range(kw)]
    x_pack = jnp.concatenate(parts, axis=-1)                # [N, Hp, OW, KW*Cin]
    x_pack = jnp.pad(x_pack, ((0, 0), (0, 0), (0, owp - ow), (0, 0)))
    x_pack = x_pack.astype(jnp.bfloat16)                    # [N, Hp, OWp, KW*Cin]

    # Weight: [Cout, Cin, KH, KW] -> [KH, KW*Cin, CoutP] matching the pack ordering.
    coutp = _round_up(cout, 128)                            # MXU N dim (lane-dense)
    w_kh = jnp.transpose(theta, (2, 3, 1, 0)).reshape(kh, kwcin, cout)
    w_kh = jnp.pad(w_kh.astype(jnp.bfloat16), ((0, 0), (0, 0), (0, coutp - cout)))
    bias = jnp.pad(specific_bias.reshape(1, cout).astype(jnp.float32),
                   ((0, 0), (0, coutp - cout)))

    # Row tile: M = TH*OWp targeted at 256-512, with the f32 accumulator bounded to
    # ~128 KiB so it stays inside the vreg file.
    # TODO(synk): if OWp alone exceeds the target (very wide images), also tile OW.
    target_m = max(128, min(512, (128 * 1024) // (4 * coutp)))
    th = _pick_row_tile(oh, owp, target_m)

    # Per-generation VMEM budget: ~75% of physical (48 MiB v7x, 96 MiB v5e/v6e).
    try:
        phys_vmem = int(pltpu.get_tpu_info().vmem_capacity_bytes)
    except Exception:
        phys_vmem = 64 << 20                                # conservative (v7x)
    vmem_cap = (phys_vmem * 3) // 4

    def _vmem_needed(th_):
        blk = (hp * owp * kwcin * 2                         # input block (bf16)
               + kh * kwcin * coutp * 2                     # weight (bf16)
               + coutp * 4                                  # bias (f32)
               + th_ * owp * cout * 4)                      # output block
        return 2 * blk + (4 << 20)                          # double buffers + headroom

    # Back off the row tile if the double-buffered block set doesn't fit the budget.
    while _vmem_needed(th) > vmem_cap and th > 1:
        th = _pick_row_tile(oh, owp, th * owp - 1)
    vmem_limit = int(min(max(_vmem_needed(th), 16 << 20), vmem_cap))

    n_row_tiles = oh // th
    grid = (n, n_row_tiles)
    # Megacore: shard batch when possible so each core keeps its own image resident.
    dim_sem = ("parallel", "arbitrary") if n >= 2 else ("arbitrary", "parallel")

    cost = pl.CostEstimate(
        flops=2 * n * oh * owp * kh * kwcin * coutp,
        transcendentals=0,
        bytes_accessed=int(x_pack.size * 2 + w_kh.size * 2 + bias.size * 4
                           + n * oh * owp * cout * 4),
    )

    kernel = functools.partial(_specific_conv2d_kernel, kh=kh, stride=stride, cout=cout)

    out_padded = pl.pallas_call(
        kernel,
        out_shape=jax.ShapeDtypeStruct((n, oh, owp, cout), out_dtype),
        grid=grid,
        in_specs=[
            pl.BlockSpec((1, hp, owp, kwcin), lambda b_idx, t_idx: (b_idx, 0, 0, 0)),
            pl.BlockSpec((kh, kwcin, coutp), lambda b_idx, t_idx: (0, 0, 0)),
            pl.BlockSpec((1, coutp), lambda b_idx, t_idx: (0, 0)),
        ],
        out_specs=pl.BlockSpec((1, th, owp, cout),
                               lambda b_idx, t_idx: (b_idx, t_idx, 0, 0)),
        compiler_params=pltpu.CompilerParams(
            dimension_semantics=dim_sem,
            vmem_limit_bytes=vmem_limit),
        cost_estimate=cost,
    )(x_pack, w_kh, bias)

    # Strip width padding, back to NCHW to match F.conv2d output convention.
    return jnp.transpose(out_padded[:, :, :ow, :], (0, 3, 1, 2))


if __name__ == "__main__":
    key = jax.random.PRNGKey(0)
    k1, k2, k3 = jax.random.split(key, 3)

    # Small shapes consistent with the module: conv weight [Cout, Cin, KH, KW].
    N, Cin, H, W = 2, 4, 16, 16
    Cout, KH, KW = 8, 3, 3
    stride, padding = 1, 1
    atten_default = 0.8

    # Deterministic parameter init (mirrors SpecificLayer.init_training_weights).
    conv_w = jax.random.normal(k1, (Cout, Cin, KH, KW), dtype=jnp.float32) * 0.1
    global_weight = conv_w[..., None]                                  # [Cout,Cin,KH,KW,1]
    global_weight_atten = jnp.ones((1,), dtype=jnp.float32) * atten_default
    specific_weight = (1.0 - global_weight_atten) * global_weight      # [Cout,Cin,KH,KW,1]
    specific_bias = jax.random.normal(k2, (Cout,), dtype=jnp.float32) * 0.1

    x = jax.random.normal(k3, (N, Cin, H, W), dtype=jnp.float32)

    out = specific_conv2d(x, global_weight, global_weight_atten, specific_weight,
                          specific_bias, stride=stride, padding=padding)
    out = jax.block_until_ready(out)

    # Reference theta / bias math (module semantics).
    theta_ref = (jnp.sum(global_weight_atten * global_weight, axis=-1)
                 + jnp.squeeze(specific_weight, axis=-1))

    # Reference 1: same bf16-quantized operands, f32 accumulation (matches MXU math).
    x_q = x.astype(jnp.bfloat16).astype(jnp.float32)
    theta_q = theta_ref.astype(jnp.bfloat16).astype(jnp.float32)
    ref_q = jax.lax.conv_general_dilated(
        x_q, theta_q, window_strides=(stride, stride),
        padding=[(padding, padding), (padding, padding)],
        dimension_numbers=("NCHW", "OIHW", "NCHW"),
        precision=jax.lax.Precision.HIGHEST,
    ) + specific_bias[None, :, None, None]

    # Reference 2: full f32 (exact module semantics) -- loose tol for bf16 operands.
    ref_f32 = jax.lax.conv_general_dilated(
        x, theta_ref, window_strides=(stride, stride),
        padding=[(padding, padding), (padding, padding)],
        dimension_numbers=("NCHW", "OIHW", "NCHW"),
        precision=jax.lax.Precision.HIGHEST,
    ) + specific_bias[None, :, None, None]

    assert out.shape == ref_f32.shape, (out.shape, ref_f32.shape)
    err_q = float(jnp.max(jnp.abs(out - ref_q)))
    err_f = float(jnp.max(jnp.abs(out - ref_f32)))
    assert jnp.allclose(out, ref_q, atol=1e-3, rtol=1e-3), err_q
    assert jnp.allclose(out, ref_f32, atol=6e-2, rtol=6e-2), err_f

    print("KERNEL_OK")
</pallas_src>

<mosaic_0001>
module attributes {stable_mosaic.version = 11 : i64} {
  func.func @_specific_conv2d_kernel(%arg0: i32, %arg1: i32, %arg2: memref<1x18x16x12xbf16, #tpu.memory_space<vmem>>, %arg3: memref<3x12x128xbf16, #tpu.memory_space<vmem>>, %arg4: memref<1x128xf32, #tpu.memory_space<vmem>>, %arg5: memref<1x16x16x8xf32, #tpu.memory_space<vmem>>) attributes {dimension_semantics = [#tpu.dimension_semantics<parallel>, #tpu.dimension_semantics<arbitrary>], iteration_bounds = array<i64: 2, 1>, scalar_prefetch = 0 : i64, scratch_operands = 0 : i64, tpu.core_type = #tpu.core_type<tc>, window_params = [{transform_indices = @transform_0, window_bounds = array<i64: 1, 18, 16, 12>}, {pipeline_mode = #tpu.pipeline_mode<synchronous>, transform_indices = @transform_1, window_bounds = array<i64: 3, 12, 128>}, {pipeline_mode = #tpu.pipeline_mode<synchronous>, transform_indices = @transform_2, window_bounds = array<i64: 1, 128>}, {transform_indices = @transform_3, window_bounds = array<i64: 1, 16, 16, 8>}]} {
    %c16_i32 = arith.constant 16 : i32
    %0 = arith.muli %arg1, %c16_i32 : i32
    %1 = tpu.assume_multiple %0, 16 : i32
    %cst = arith.constant 0.000000e+00 : f32
    %2 = vector.broadcast %cst : f32 to vector<256x128xf32>
    %c0_i32 = arith.constant 0 : i32
    %3 = arith.addi %1, %c0_i32 : i32
    %c0 = arith.constant 0 : index
    %4 = arith.index_cast %3 : i32 to index
    %c0_0 = arith.constant 0 : index
    %c0_1 = arith.constant 0 : index
    %5 = vector.load %arg2[%c0, %4, %c0_0, %c0_1] : memref<1x18x16x12xbf16, #tpu.memory_space<vmem>>, vector<1x16x16x12xbf16>
    %6 = vector.shape_cast %5 : vector<1x16x16x12xbf16> to vector<16x16x12xbf16>
    %7 = vector.shape_cast %6 : vector<16x16x12xbf16> to vector<256x12xbf16>
    %c0_2 = arith.constant 0 : index
    %c0_3 = arith.constant 0 : index
    %c0_4 = arith.constant 0 : index
    %8 = vector.load %arg3[%c0_2, %c0_3, %c0_4] : memref<3x12x128xbf16, #tpu.memory_space<vmem>>, vector<1x12x128xbf16>
    %9 = vector.shape_cast %8 : vector<1x12x128xbf16> to vector<12x128xbf16>
    %cst_5 = arith.constant dense<0.000000e+00> : vector<256x128xf32>
    %10 = tpu.matmul %7, %9, %cst_5 {dimension_numbers = #tpu.dot_dimension_numbers<[1], [0], [0], [1], [0, 0, 1, 1], [], []>} : vector<256x12xbf16>, vector<12x128xbf16>, vector<256x128xf32> -> vector<256x128xf32>
    %11 = arith.addf %2, %10 : vector<256x128xf32>
    %c1_i32 = arith.constant 1 : i32
    %12 = arith.addi %1, %c1_i32 : i32
    %c0_6 = arith.constant 0 : index
    %13 = arith.index_cast %12 : i32 to index
    %c0_7 = arith.constant 0 : index
    %c0_8 = arith.constant 0 : index
    %14 = vector.load %arg2[%c0_6, %13, %c0_7, %c0_8] : memref<1x18x16x12xbf16, #tpu.memory_space<vmem>>, vector<1x16x16x12xbf16>
    %15 = vector.shape_cast %14 : vector<1x16x16x12xbf16> to vector<16x16x12xbf16>
    %16 = vector.shape_cast %15 : vector<16x16x12xbf16> to vector<256x12xbf16>
    %c1 = arith.constant 1 : index
    %c0_9 = arith.constant 0 : index
    %c0_10 = arith.constant 0 : index
    %17 = vector.load %arg3[%c1, %c0_9, %c0_10] : memref<3x12x128xbf16, #tpu.memory_space<vmem>>, vector<1x12x128xbf16>
    %18 = vector.shape_cast %17 : vector<1x12x128xbf16> to vector<12x128xbf16>
    %cst_11 = arith.constant dense<0.000000e+00> : vector<256x128xf32>
    %19 = tpu.matmul %16, %18, %cst_11 {dimension_numbers = #tpu.dot_dimension_numbers<[1], [0], [0], [1], [0, 0, 1, 1], [], []>} : vector<256x12xbf16>, vector<12x128xbf16>, vector<256x128xf32> -> vector<256x128xf32>
    %20 = arith.addf %11, %19 : vector<256x128xf32>
    %c2_i32 = arith.constant 2 : i32
    %21 = arith.addi %1, %c2_i32 : i32
    %c0_12 = arith.constant 0 : index
    %22 = arith.index_cast %21 : i32 to index
    %c0_13 = arith.constant 0 : index
    %c0_14 = arith.constant 0 : index
    %23 = vector.load %arg2[%c0_12, %22, %c0_13, %c0_14] : memref<1x18x16x12xbf16, #tpu.memory_space<vmem>>, vector<1x16x16x12xbf16>
    %24 = vector.shape_cast %23 : vector<1x16x16x12xbf16> to vector<16x16x12xbf16>
    %25 = vector.shape_cast %24 : vector<16x16x12xbf16> to vector<256x12xbf16>
    %c2 = arith.constant 2 : index
    %c0_15 = arith.constant 0 : index
    %c0_16 = arith.constant 0 : index
    %26 = vector.load %arg3[%c2, %c0_15, %c0_16] : memref<3x12x128xbf16, #tpu.memory_space<vmem>>, vector<1x12x128xbf16>
    %27 = vector.shape_cast %26 : vector<1x12x128xbf16> to vector<12x128xbf16>
    %cst_17 = arith.constant dense<0.000000e+00> : vector<256x128xf32>
    %28 = tpu.matmul %25, %27, %cst_17 {dimension_numbers = #tpu.dot_dimension_numbers<[1], [0], [0], [1], [0, 0, 1, 1], [], []>} : vector<256x12xbf16>, vector<12x128xbf16>, vector<256x128xf32> -> vector<256x128xf32>
    %29 = arith.addf %20, %28 : vector<256x128xf32>
    %c0_18 = arith.constant 0 : index
    %c0_19 = arith.constant 0 : index
    %30 = vector.load %arg4[%c0_18, %c0_19] : memref<1x128xf32, #tpu.memory_space<vmem>>, vector<1x128xf32>
    %31 = vector.broadcast %30 : vector<1x128xf32> to vector<256x128xf32>
    %32 = arith.addf %29, %31 : vector<256x128xf32>
    %33 = vector.extract_strided_slice %32 {offsets = [0, 0], sizes = [256, 8], strides = [1, 1]} : vector<256x128xf32> to vector<256x8xf32>
    %34 = vector.shape_cast %33 : vector<256x8xf32> to vector<1x16x16x8xf32>
    %c0_20 = arith.constant 0 : index
    %c0_21 = arith.constant 0 : index
    %c0_22 = arith.constant 0 : index
    %c0_23 = arith.constant 0 : index
    %35 = vector.load %arg5[%c0_20, %c0_21, %c0_22, %c0_23] : memref<1x16x16x8xf32, #tpu.memory_space<vmem>>, vector<1x16x16x8xf32>
    tpu.vector_store %arg5[%c0_20, %c0_21, %c0_22, %c0_23], %34 {strides = array<i32>} : memref<1x16x16x8xf32, #tpu.memory_space<vmem>>, vector<1x16x16x8xf32>,
    return
  }
  func.func @transform_0(%arg0: i32, %arg1: i32) -> (i32, i32, i32, i32) {
    %c0_i32 = arith.constant 0 : i32
    %c0_i32_0 = arith.constant 0 : i32
    %c0_i32_1 = arith.constant 0 : i32
    %c0_i32_2 = arith.constant 0 : i32
    return %arg0, %c0_i32, %c0_i32_0, %c0_i32_1 : i32, i32, i32, i32
  }
  func.func @transform_1(%arg0: i32, %arg1: i32) -> (i32, i32, i32) {
    %c0_i32 = arith.constant 0 : i32
    %c0_i32_0 = arith.constant 0 : i32
    %c0_i32_1 = arith.constant 0 : i32
    %c0_i32_2 = arith.constant 0 : i32
    return %c0_i32, %c0_i32_0, %c0_i32_1 : i32, i32, i32
  }
  func.func @transform_2(%arg0: i32, %arg1: i32) -> (i32, i32) {
    %c0_i32 = arith.constant 0 : i32
    %c0_i32_0 = arith.constant 0 : i32
    %c0_i32_1 = arith.constant 0 : i32
    return %c0_i32, %c0_i32_0 : i32, i32
  }
  func.func @transform_3(%arg0: i32, %arg1: i32) -> (i32, i32, i32, i32) {
    %c0_i32 = arith.constant 0 : i32
    %c0_i32_0 = arith.constant 0 : i32
    %c0_i32_1 = arith.constant 0 : i32
    return %arg0, %arg1, %c0_i32, %c0_i32_0 : i32, i32, i32, i32
  }
}

</mosaic_0001>

<bundles_post_ra>
// kernel: tpu_custom_call.1
= control target key start
LH: loop header
LB: loop body
LE: loop exit
PB: predicated region body
PF: predicated region fallthrough
CT: control target
= control target key end

     0   :  { %s1643_s12 = smov 0   ;;  %s1645_s13 = smov 0   ;;  %s1950_s0 = inlined_call_operand.vmem [shape: bf16[2,18,16,12], index: 0, kind: input, shape index: {}]   ;;  %s1951_s1 = inlined_call_operand.vmem [shape: bf16[3,12,128], index: 1, kind: input, shape index: {}]   ;;  %s1952_s2 = inlined_call_operand.vmem [shape: f32[1,128], index: 2, kind: input, shape index: {}]   ;;  %s1953_s3 = inlined_call_operand.vmem [shape: f32[2,16,16,8], index: 3, kind: output, shape index: {}]  }
   0x1   :  { %s1647_s14 = smov 0  }
   0x2 LB: > { %s25_s15 = sadd.s32 1, %s1617_s13  ;;  %p1192_p0 = scmp.ge.s32.totalorder %s1621_s14, 1  ;;  %s1621_s14 = sphi %s1647_s14, %s13_s14   ;;  %s1617_s13 = sphi %s1645_s13, %s1955_s13   ;;  %s1613_s12 = sphi %s1643_s12, %s1954_s12  }
   0x3   : > { %p27_p1 = scmp.ge.s32.totalorder %s25_s15, 2  ;;  %p151_p2 = scmp.lt.s32.totalorder %s1621_s14, 3 }
   0x5   : > { %s1957_s15 = smov (%p27_p1, %s25_s15), 0  ;;  %p152_p3 = pnand %p1192_p0, %p151_p2 }
   0x6   : > { %p180_p4 = scmp.lt.s32.totalorder (!%p152_p3), %s1613_s12, 1 }
   0x7   : > { %155 = sbr.rel (%p152_p3) target bundleno = 342 (0x156), region = 32 }
   0xc   : > { %v1296_v0 = vld [vmem:[%s1951_s1 + $0x8] sm:$0xf]  ;;  %v1552_v1 = vld [vmem:[%s1951_s1 + $0x8] sm:$0x30]  ;;  %vm408_vm0 = vcmask 1045504   ;;  %s1959_s12 = smov (!%p180_p4, %s1613_s12), 1 }
   0xd   : > { %v1297_v2 = vor.u32 %v1552_v1, %v1296_v0  ;;  %v1380_v3 = vld [vmem:[%s1951_s1] sm:$0xf]  ;;  %v1535_v4 = vld [vmem:[%s1951_s1] sm:$0x30]  ;;  %v1498_v5 = vld [vmem:[%s1951_s1 + $0x10] sm:$0xf] }
   0xe   : > { %v1381_v6 = vor.u32 %v1535_v4, %v1380_v3  ;;  %v1569_v7 = vld [vmem:[%s1951_s1 + $0x10] sm:$0x30]  ;;  %s1573_s28 = smul.u32 144, %s1959_s12  ;;  %vm359_vm1 = vcmask 97280   ;;  %s1518_s5 = sshll.u32 %s1959_s12, 8  ;;  %vm1058_vm2 = vcmask 64512  }
   0xf   : > { %v410_v8 = vsel %vm408_vm0, %v1297_v2, 0  ;;  %v1499_v9 = vor.u32 %v1569_v7, %v1498_v5  ;;  %v1768_v52 = vld [vmem:[%s1952_s2] ss:$0 sm:$0xff]  ;;  %s1773_s10 = scalar_lea.vmem %s1953_s3, %s1518_s5 }
  0x10   : > { %419 = vmatpush.bf16.msra.mxu0 %v410_v8  ;;  %1570 = vmatpush.bf16.msra.mxu3 %v410_v8  ;;  %v635_v10 = vsel %vm408_vm0, %v1381_v6, 0  ;;  %s1688_s4 = scalar_lea.vmem %s1950_s0, %s1573_s28 }
  0x11   : > { %644 = vmatpush.bf16.msra.mxu1 %v635_v10  ;;  %v899_v11 = vsel %vm408_vm0, %v1499_v9, 0  ;;  %v1536_v12 = vld [vmem:[%s1688_s4 + $0x8] sm:$0xff]  ;;  %v1519_v14 = vld [vmem:[%s1688_s4] sm:$0xff]  ;;  %v1553_v15 = vld [vmem:[%s1688_s4 + $0x10] sm:$0xff] }
  0x12   : > { %908 = vmatpush.bf16.msra.mxu2 %v899_v11  ;;  %v1548_v13 = vld [vmem:[%s1688_s4 + $0x68] sm:$0xff]  ;;  %v1537_v16 = vld [vmem:[%s1688_s4 + $0x10] sm:$0xff]  ;;  %v1554_v19 = vld [vmem:[%s1688_s4 + $0x18] sm:$0xff] }
  0x13   : > { %1298 = vmatmul.msk.bf16.vlgmr.msra.gmra.mxu0 %vm359_vm1, %v1536_v12  ;;  %1310 = vmatmul.msk.bf16.vlgmr.msra.gmra.mxu3 %vm359_vm1, %v1548_v13  ;;  %v1549_v17 = vld [vmem:[%s1688_s4 + $0x70] sm:$0xff]  ;;  %v1520_v18 = vld [vmem:[%s1688_s4 + $0x8] sm:$0xff]  ;;  %v1538_v20 = vld [vmem:[%s1688_s4 + $0x18] sm:$0xff] }
  0x14   : > { %1571 = vmatpush.bf16.msrb.mxu3 %v635_v10  ;;  %1382 = vmatmul.msk.bf16.vlgmr.msra.gmra.mxu1 %vm359_vm1, %v1519_v14  ;;  %v1550_v21 = vld [vmem:[%s1688_s4 + $0x78] sm:$0xff]  ;;  %v1521_v22 = vld [vmem:[%s1688_s4 + $0x10] sm:$0xff]  ;;  %v1555_v23 = vld [vmem:[%s1688_s4 + $0x20] sm:$0xff] }
  0x15   : > { %1500 = vmatmul.msk.bf16.vlgmr.msra.gmra.mxu2 %vm359_vm1, %v1553_v15  ;;  %v1539_v24 = vld [vmem:[%s1688_s4 + $0x20] sm:$0xff]  ;;  %v1522_v26 = vld [vmem:[%s1688_s4 + $0x18] sm:$0xff]  ;;  %v1556_v27 = vld [vmem:[%s1688_s4 + $0x28] sm:$0xff] }
  0x16   : > { %v1551_v25 = vld [vmem:[%s1688_s4 + $0x80] sm:$0xff]  ;;  %v1540_v28 = vld [vmem:[%s1688_s4 + $0x28] sm:$0xff]  ;;  %v1557_v31 = vld [vmem:[%s1688_s4 + $0x30] sm:$0xff] }
  0x17   : > { %v1531_v29 = vld [vmem:[%s1688_s4 + $0x60] sm:$0xff]  ;;  %v1541_v32 = vld [vmem:[%s1688_s4 + $0x30] sm:$0xff]  ;;  %v1532_v33 = vld [vmem:[%s1688_s4 + $0x68] sm:$0xff] }
  0x18   : > { %1572 = vmatpush.bf16.msra.mxu3 %v899_v11  ;;  %v1523_v30 = vld [vmem:[%s1688_s4 + $0x20] sm:$0xff]  ;;  %v1524_v34 = vld [vmem:[%s1688_s4 + $0x28] sm:$0xff]  ;;  %v1558_v35 = vld [vmem:[%s1688_s4 + $0x38] sm:$0xff] }
  0x19   : > { %v1542_v36 = vld [vmem:[%s1688_s4 + $0x38] sm:$0xff]  ;;  %v1533_v37 = vld [vmem:[%s1688_s4 + $0x70] sm:$0xff]  ;;  %v1559_v39 = vld [vmem:[%s1688_s4 + $0x40] sm:$0xff] }
  0x1a   : > { %v1525_v38 = vld [vmem:[%s1688_s4 + $0x30] sm:$0xff]  ;;  %v1543_v40 = vld [vmem:[%s1688_s4 + $0x40] sm:$0xff]  ;;  %v1534_v41 = vld [vmem:[%s1688_s4 + $0x78] sm:$0xff] }
  0x1b   : > { %v1526_v42 = vld [vmem:[%s1688_s4 + $0x38] sm:$0xff]  ;;  %v1560_v43 = vld [vmem:[%s1688_s4 + $0x48] sm:$0xff]  ;;  %v1565_v45 = vld [vmem:[%s1688_s4 + $0x70] sm:$0xff] }
  0x1c   : > { %v1544_v44 = vld [vmem:[%s1688_s4 + $0x48] sm:$0xff]  ;;  %v1527_v47 = vld [vmem:[%s1688_s4 + $0x40] sm:$0xff]  ;;  %v1561_v48 = vld [vmem:[%s1688_s4 + $0x50] sm:$0xff] }
  0x1d   : > { %v1545_v61 = vld [vmem:[%s1688_s4 + $0x50] sm:$0xff]  ;;  %v1566_v62 = vld [vmem:[%s1688_s4 + $0x78] sm:$0xff]  ;;  %v1528_v1 = vld [vmem:[%s1688_s4 + $0x48] sm:$0xff] }
  0x1e   : > { %v1562_v2 = vld [vmem:[%s1688_s4 + $0x58] sm:$0xff] }
  0x1f   : > { %v1546_v15 = vld [vmem:[%s1688_s4 + $0x58] sm:$0xff] }
  0x23   : > { %1299 = vmatmul.msk.bf16.gmra.mxu0 %vm359_vm1, %v1537_v16  ;;  %1311 = vmatmul.msk.bf16.gmra.mxu3 %vm359_vm1, %v1549_v17  ;;  %v1567_v16 = vld [vmem:[%s1688_s4 + $0x80] sm:$0xff] }
  0x24   : > { %1383 = vmatmul.msk.bf16.gmra.mxu1 %vm359_vm1, %v1520_v18 }
  0x25   : > { %1501 = vmatmul.msk.bf16.gmra.mxu2 %vm359_vm1, %v1554_v19  ;;  %v1529_v19 = vld [vmem:[%s1688_s4 + $0x50] sm:$0xff] }
  0x33   : > { %1300 = vmatmul.msk.bf16.gmra.mxu0 %vm359_vm1, %v1538_v20  ;;  %1312 = vmatmul.msk.bf16.gmra.mxu3 %vm359_vm1, %v1550_v21  ;;  %v1563_v20 = vld [vmem:[%s1688_s4 + $0x60] sm:$0xff] }
  0x34   : > { %1384 = vmatmul.msk.bf16.gmra.mxu1 %vm359_vm1, %v1521_v22 }
  0x35   : > { %1502 = vmatmul.msk.bf16.gmra.mxu2 %vm359_vm1, %v1555_v23 }
  0x43   : > { %1301 = vmatmul.msk.bf16.gmra.mxu0 %vm359_vm1, %v1539_v24  ;;  %1313 = vmatmul.msk.bf16.gmra.mxu3 %vm359_vm1, %v1551_v25 }
  0x44   : > { %1385 = vmatmul.msk.bf16.gmra.mxu1 %vm359_vm1, %v1522_v26 }
  0x45   : > { %1503 = vmatmul.msk.bf16.gmra.mxu2 %vm359_vm1, %v1556_v27 }
  0x53   : > { %1302 = vmatmul.msk.bf16.gmra.mxu0 %vm359_vm1, %v1540_v28  ;;  %1394 = vmatmul.msk.bf16.vlgmr.msrb.gmra.mxu3 %vm359_vm1, %v1531_v29 }
  0x54   : > { %1386 = vmatmul.msk.bf16.gmra.mxu1 %vm359_vm1, %v1523_v30 }
  0x55   : > { %1504 = vmatmul.msk.bf16.gmra.mxu2 %vm359_vm1, %v1557_v31 }
  0x63   : > { %1303 = vmatmul.msk.bf16.gmra.mxu0 %vm359_vm1, %v1541_v32  ;;  %1395 = vmatmul.msk.bf16.gmra.mxu3 %vm359_vm1, %v1532_v33  ;;  %v1547_v33 = vld [vmem:[%s1688_s4 + $0x60] sm:$0xff] }
  0x64   : > { %1387 = vmatmul.msk.bf16.gmra.mxu1 %vm359_vm1, %v1524_v34  ;;  %v1568_v34 = vld [vmem:[%s1688_s4 + $0x88] sm:$0xff] }
  0x65   : > { %1505 = vmatmul.msk.bf16.gmra.mxu2 %vm359_vm1, %v1558_v35 }
  0x73   : > { %1304 = vmatmul.msk.bf16.gmra.mxu0 %vm359_vm1, %v1542_v36  ;;  %1396 = vmatmul.msk.bf16.gmra.mxu3 %vm359_vm1, %v1533_v37  ;;  %v1530_v37 = vld [vmem:[%s1688_s4 + $0x58] sm:$0xff] }
  0x74   : > { %1388 = vmatmul.msk.bf16.gmra.mxu1 %vm359_vm1, %v1525_v38  ;;  %v1564_v38 = vld [vmem:[%s1688_s4 + $0x68] sm:$0xff] }
  0x75   : > { %1506 = vmatmul.msk.bf16.gmra.mxu2 %vm359_vm1, %v1559_v39 }
  0x83   : > { %1305 = vmatmul.msk.bf16.gmra.mxu0 %vm359_vm1, %v1543_v40  ;;  %1397 = vmatmul.msk.bf16.gmra.mxu3 %vm359_vm1, %v1534_v41 }
  0x84   : > { %1389 = vmatmul.msk.bf16.gmra.mxu1 %vm359_vm1, %v1526_v42 }
  0x85   : > { %1507 = vmatmul.msk.bf16.gmra.mxu2 %vm359_vm1, %v1560_v43 }
  0x90   : > { %v421_v46 = vpop.f32.mrf.mxu0 }
  0x91   : > { %v646_v49 = vpop.f32.mrf.mxu1 }
  0x92   : > { %v647_v50 = vadd.f32 %v646_v49, %v421_v46 }
  0x93   : > { %1306 = vmatmul.msk.bf16.gmra.mxu0 %vm359_vm1, %v1544_v44  ;;  %1512 = vmatmul.msk.bf16.vlgmr.msra.gmra.mxu3 %vm359_vm1, %v1565_v45 }
  0x94   : > { %1390 = vmatmul.msk.bf16.gmra.mxu1 %vm359_vm1, %v1527_v47 }
  0x95   : > { %1508 = vmatmul.msk.bf16.gmra.mxu2 %vm359_vm1, %v1561_v48 }
  0x96   : > { %v1762_v51 = vpop.f32.mrf.mxu3 }
  0x98   : > { %v910_v53 = vpop.f32.mrf.mxu2  ;;  %v423_v55 = vpop.f32.mrf.mxu0 }
  0x99   : > { %v990_v54 = vadd.f32 %v910_v53, %v647_v50  ;;  %v648_v56 = vpop.f32.mrf.mxu1 }
  0x9a   : > { %v649_v58 = vadd.f32 %v648_v56, %v423_v55 }
  0x9b   : > { %v1026_v57 = vadd.f32 %v1768_v52, %v990_v54 }
  0x9d   : > { %1059 = vst.msk [vmem:[%s1773_s10] sm:$0xff] %vm1058_vm2, %v1026_v57 }
  0x9e   : > { %v1778_v59 = vpop.f32.mrf.mxu3 }
  0xa0   : > { %v912_v60 = vpop.f32.mrf.mxu2  ;;  %v426_v0 = vpop.f32.mrf.mxu0 }
  0xa1   : > { %v991_v63 = vadd.f32 %v912_v60, %v649_v58  ;;  %v651_v3 = vpop.f32.mrf.mxu1 }
  0xa2   : > { %v652_v5 = vadd.f32 %v651_v3, %v426_v0 }
  0xa3   : > { %v1027_v4 = vadd.f32 %v1768_v52, %v991_v63  ;;  %1307 = vmatmul.msk.bf16.gmra.mxu0 %vm359_vm1, %v1545_v61  ;;  %1513 = vmatmul.msk.bf16.gmra.mxu3 %vm359_vm1, %v1566_v62 }
  0xa4   : > { %1391 = vmatmul.msk.bf16.gmra.mxu1 %vm359_vm1, %v1528_v1 }
  0xa5   : > { %1060 = vst.msk [vmem:[%s1773_s10 + $0x8] sm:$0xff] %vm1058_vm2, %v1027_v4  ;;  %1509 = vmatmul.msk.bf16.gmra.mxu2 %vm359_vm1, %v1562_v2 }
  0xa6   : > { %v1791_v6 = vpop.f32.mrf.mxu3 }
  0xa8   : > { %v915_v7 = vpop.f32.mrf.mxu2  ;;  %v428_v9 = vpop.f32.mrf.mxu0 }
  0xa9   : > { %v992_v8 = vadd.f32 %v915_v7, %v652_v5  ;;  %v653_v10 = vpop.f32.mrf.mxu1 }
  0xaa   : > { %v654_v12 = vadd.f32 %v653_v10, %v428_v9 }
  0xab   : > { %v1028_v11 = vadd.f32 %v1768_v52, %v992_v8 }
  0xad   : > { %1061 = vst.msk [vmem:[%s1773_s10 + $0x10] sm:$0xff] %vm1058_vm2, %v1028_v11 }
  0xae   : > { %v1796_v13 = vpop.f32.mrf.mxu3 }
  0xb0   : > { %v917_v14 = vpop.f32.mrf.mxu2  ;;  %v431_v18 = vpop.f32.mrf.mxu0 }
  0xb1   : > { %v993_v17 = vadd.f32 %v917_v14, %v654_v12  ;;  %v656_v21 = vpop.f32.mrf.mxu1 }
  0xb2   : > { %v657_v23 = vadd.f32 %v656_v21, %v431_v18 }
  0xb3   : > { %v1029_v22 = vadd.f32 %v1768_v52, %v993_v17  ;;  %1308 = vmatmul.msk.bf16.gmra.mxu0 %vm359_vm1, %v1546_v15  ;;  %1514 = vmatmul.msk.bf16.gmra.mxu3 %vm359_vm1, %v1567_v16 }
  0xb4   : > { %1392 = vmatmul.msk.bf16.gmra.mxu1 %vm359_vm1, %v1529_v19 }
  0xb5   : > { %1062 = vst.msk [vmem:[%s1773_s10 + $0x18] sm:$0xff] %vm1058_vm2, %v1029_v22  ;;  %1510 = vmatmul.msk.bf16.gmra.mxu2 %vm359_vm1, %v1563_v20 }
  0xb6   : > { %v1809_v24 = vpop.f32.mrf.mxu3 }
  0xb8   : > { %v920_v25 = vpop.f32.mrf.mxu2  ;;  %v433_v27 = vpop.f32.mrf.mxu0 }
  0xb9   : > { %v994_v26 = vadd.f32 %v920_v25, %v657_v23  ;;  %v658_v28 = vpop.f32.mrf.mxu1 }
  0xba   : > { %v659_v30 = vadd.f32 %v658_v28, %v433_v27 }
  0xbb   : > { %v1030_v29 = vadd.f32 %v1768_v52, %v994_v26 }
  0xbd   : > { %1063 = vst.msk [vmem:[%s1773_s10 + $0x20] sm:$0xff] %vm1058_vm2, %v1030_v29 }
  0xbe   : > { %v1814_v31 = vpop.f32.mrf.mxu3 }
  0xc0   : > { %v922_v32 = vpop.f32.mrf.mxu2  ;;  %v436_v36 = vpop.f32.mrf.mxu0 }
  0xc1   : > { %v995_v35 = vadd.f32 %v922_v32, %v659_v30  ;;  %v661_v39 = vpop.f32.mrf.mxu1 }
  0xc2   : > { %v662_v41 = vadd.f32 %v661_v39, %v436_v36 }
  0xc3   : > { %v1031_v40 = vadd.f32 %v1768_v52, %v995_v35  ;;  %1309 = vmatmul.msk.bf16.gmra.mxu0 %vm359_vm1, %v1547_v33  ;;  %1515 = vmatmul.msk.bf16.gmra.mxu3 %vm359_vm1, %v1568_v34 }
  0xc4   : > { %1393 = vmatmul.msk.bf16.gmra.mxu1 %vm359_vm1, %v1530_v37 }
  0xc5   : > { %1064 = vst.msk [vmem:[%s1773_s10 + $0x28] sm:$0xff] %vm1058_vm2, %v1031_v40  ;;  %1511 = vmatmul.msk.bf16.gmra.mxu2 %vm359_vm1, %v1564_v38 }
  0xc6   : > { %v1827_v42 = vpop.f32.mrf.mxu3 }
  0xc8   : > { %v925_v43 = vpop.f32.mrf.mxu2  ;;  %v438_v45 = vpop.f32.mrf.mxu0 }
  0xc9   : > { %v996_v44 = vadd.f32 %v925_v43, %v662_v41  ;;  %v663_v46 = vpop.f32.mrf.mxu1 }
  0xca   : > { %v664_v48 = vadd.f32 %v663_v46, %v438_v45 }
  0xcb   : > { %v1032_v47 = vadd.f32 %v1768_v52, %v996_v44 }
  0xcd   : > { %1065 = vst.msk [vmem:[%s1773_s10 + $0x30] sm:$0xff] %vm1058_vm2, %v1032_v47 }
  0xce   : > { %v1832_v49 = vpop.f32.mrf.mxu3 }
  0xd0   : > { %v927_v50 = vpop.f32.mrf.mxu2  ;;  %v441_v54 = vpop.f32.mrf.mxu0 }
  0xd1   : > { %v997_v53 = vadd.f32 %v927_v50, %v664_v48  ;;  %v666_v55 = vpop.f32.mrf.mxu1 }
  0xd2   : > { %v667_v57 = vadd.f32 %v666_v55, %v441_v54 }
  0xd3   : > { %v1033_v56 = vadd.f32 %v1768_v52, %v997_v53 }
  0xd5   : > { %1066 = vst.msk [vmem:[%s1773_s10 + $0x38] sm:$0xff] %vm1058_vm2, %v1033_v56 }
  0xd6   : > { %v1837_v58 = vpop.f32.mrf.mxu3 }
  0xd8   : > { %v930_v60 = vpop.f32.mrf.mxu2  ;;  %v443_v62 = vpop.f32.mrf.mxu0 }
  0xd9   : > { %v998_v61 = vadd.f32 %v930_v60, %v667_v57  ;;  %v668_v63 = vpop.f32.mrf.mxu1 }
  0xda   : > { %v669_v1 = vadd.f32 %v668_v63, %v443_v62 }
  0xdb   : > { %v1034_v0 = vadd.f32 %v1768_v52, %v998_v61  ;;  %v707_v61 = vadd.f32 %v1837_v58, %v1762_v51 }
  0xdd   : > { %1067 = vst.msk [vmem:[%s1773_s10 + $0x40] sm:$0xff] %vm1058_vm2, %v1034_v0 }
  0xde   : > { %v1842_v2 = vpop.f32.mrf.mxu3 }
  0xe0   : > { %v932_v3 = vpop.f32.mrf.mxu2  ;;  %v446_v5 = vpop.f32.mrf.mxu0 }
  0xe1   : > { %v999_v4 = vadd.f32 %v932_v3, %v669_v1  ;;  %v671_v7 = vpop.f32.mrf.mxu1 }
  0xe2   : > { %v672_v9 = vadd.f32 %v671_v7, %v446_v5 }
  0xe3   : > { %v1035_v8 = vadd.f32 %v1768_v52, %v999_v4 }
  0xe5   : > { %1068 = vst.msk [vmem:[%s1773_s10 + $0x48] sm:$0xff] %vm1058_vm2, %v1035_v8  ;;  %v709_v8 = vadd.f32 %v1842_v2, %v1778_v59 }
  0xe6   : > { %v1847_v10 = vpop.f32.mrf.mxu3 }
  0xe7   : > { %v712_v59 = vadd.f32 %v1847_v10, %v1791_v6 }
  0xe8   : > { %v935_v11 = vpop.f32.mrf.mxu2  ;;  %v448_v14 = vpop.f32.mrf.mxu0 }
  0xe9   : > { %v1000_v12 = vadd.f32 %v935_v11, %v672_v9  ;;  %v673_v15 = vpop.f32.mrf.mxu1 }
  0xea   : > { %v674_v17 = vadd.f32 %v673_v15, %v448_v14 }
  0xeb   : > { %v1036_v16 = vadd.f32 %v1768_v52, %v1000_v12 }
  0xed   : > { %1069 = vst.msk [vmem:[%s1773_s10 + $0x50] sm:$0xff] %vm1058_vm2, %v1036_v16 }
  0xee   : > { %v1852_v18 = vpop.f32.mrf.mxu3 }
  0xf0   : > { %v937_v19 = vpop.f32.mrf.mxu2  ;;  %v451_v21 = vpop.f32.mrf.mxu0 }
  0xf1   : > { %v1001_v20 = vadd.f32 %v937_v19, %v674_v17  ;;  %v676_v22 = vpop.f32.mrf.mxu1 }
  0xf2   : > { %v677_v25 = vadd.f32 %v676_v22, %v451_v21 }
  0xf3   : > { %v1037_v23 = vadd.f32 %v1768_v52, %v1001_v20 }
  0xf5   : > { %1070 = vst.msk [vmem:[%s1773_s10 + $0x58] sm:$0xff] %vm1058_vm2, %v1037_v23 }
  0xf6   : > { %v1857_v26 = vpop.f32.mrf.mxu3 }
  0xf8   : > { %v940_v27 = vpop.f32.mrf.mxu2  ;;  %v453_v29 = vpop.f32.mrf.mxu0 }
  0xf9   : > { %v1002_v28 = vadd.f32 %v940_v27, %v677_v25  ;;  %v678_v30 = vpop.f32.mrf.mxu1 }
  0xfa   : > { %v679_v33 = vadd.f32 %v678_v30, %v453_v29  ;;  %v714_v29 = vadd.f32 %v1852_v18, %v1796_v13  ;;  %v717_v13 = vadd.f32 %v1857_v26, %v1809_v24 }
  0xfb   : > { %v1038_v32 = vadd.f32 %v1768_v52, %v1002_v28 }
  0xfd   : > { %1071 = vst.msk [vmem:[%s1773_s10 + $0x60] sm:$0xff] %vm1058_vm2, %v1038_v32 }
  0xfe   : > { %v1862_v34 = vpop.f32.mrf.mxu3 }
 0x100   : > { %v942_v35 = vpop.f32.mrf.mxu2  ;;  %v456_v37 = vpop.f32.mrf.mxu0 }
 0x101   : > { %v1003_v36 = vadd.f32 %v942_v35, %v679_v33  ;;  %v681_v38 = vpop.f32.mrf.mxu1 }
 0x102   : > { %v682_v40 = vadd.f32 %v681_v38, %v456_v37 }
 0x103   : > { %v1039_v39 = vadd.f32 %v1768_v52, %v1003_v36 }
 0x105   : > { %1072 = vst.msk [vmem:[%s1773_s10 + $0x68] sm:$0xff] %vm1058_vm2, %v1039_v39 }
 0x106   : > { %v1867_v41 = vpop.f32.mrf.mxu3 }
 0x108   : > { %v945_v43 = vpop.f32.mrf.mxu2  ;;  %v458_v45 = vpop.f32.mrf.mxu0 }
 0x109   : > { %v1004_v44 = vadd.f32 %v945_v43, %v682_v40  ;;  %v683_v46 = vpop.f32.mrf.mxu1 }
 0x10a   : > { %v684_v48 = vadd.f32 %v683_v46, %v458_v45 }
 0x10b   : > { %v1040_v47 = vadd.f32 %v1768_v52, %v1004_v44 }
 0x10d   : > { %1073 = vst.msk [vmem:[%s1773_s10 + $0x70] sm:$0xff] %vm1058_vm2, %v1040_v47 }
 0x10e   : > { %v1872_v50 = vpop.f32.mrf.mxu3 }
 0x110   : > { %v947_v53 = vpop.f32.mrf.mxu2  ;;  %v461_v55 = vpop.f32.mrf.mxu0 }
 0x111   : > { %v1005_v54 = vadd.f32 %v947_v53, %v684_v48  ;;  %v686_v56 = vpop.f32.mrf.mxu1  ;;  %v719_v53 = vadd.f32 %v1862_v34, %v1814_v31  ;;  %v722_v31 = vadd.f32 %v1867_v41, %v1827_v42 }
 0x112   : > { %v687_v60 = vadd.f32 %v686_v56, %v461_v55 }
 0x113   : > { %v1041_v57 = vadd.f32 %v1768_v52, %v1005_v54 }
 0x115   : > { %1074 = vst.msk [vmem:[%s1773_s10 + $0x78] sm:$0xff] %vm1058_vm2, %v1041_v57 }
 0x116   : > { %v970_v62 = vpop.f32.mrf.mxu3 }
 0x117   : > { %v1014_v0 = vadd.f32 %v970_v62, %v707_v61 }
 0x118   : > { %v950_v63 = vpop.f32.mrf.mxu2  ;;  %v463_v3 = vpop.f32.mrf.mxu0 }
 0x119   : > { %v1006_v1 = vadd.f32 %v950_v63, %v687_v60  ;;  %v1050_v4 = vadd.f32 %v1768_v52, %v1014_v0  ;;  %v688_v5 = vpop.f32.mrf.mxu1 }
 0x11a   : > { %v689_v51 = vadd.f32 %v688_v5, %v463_v3 }
 0x11b   : > { %v1042_v7 = vadd.f32 %v1768_v52, %v1006_v1  ;;  %1083 = vst.msk [vmem:[%s1773_s10 + $0xc0] sm:$0xff] %vm1058_vm2, %v1050_v4 }
 0x11d   : > { %1075 = vst.msk [vmem:[%s1773_s10 + $0x80] sm:$0xff] %vm1058_vm2, %v1042_v7 }
 0x11e   : > { %v972_v58 = vpop.f32.mrf.mxu3 }
 0x11f   : > { %v1015_v11 = vadd.f32 %v972_v58, %v709_v8 }
 0x120   : > { %v952_v9 = vpop.f32.mrf.mxu2  ;;  %v466_v14 = vpop.f32.mrf.mxu0 }
 0x121   : > { %v1007_v12 = vadd.f32 %v952_v9, %v689_v51  ;;  %v1051_v15 = vadd.f32 %v1768_v52, %v1015_v11  ;;  %v691_v16 = vpop.f32.mrf.mxu1  ;;  %v724_v51 = vadd.f32 %v1872_v50, %v1832_v49 }
 0x122   : > { %v692_v19 = vadd.f32 %v691_v16, %v466_v14 }
 0x123   : > { %v1043_v17 = vadd.f32 %v1768_v52, %v1007_v12  ;;  %1084 = vst.msk [vmem:[%s1773_s10 + $0xc8] sm:$0xff] %vm1058_vm2, %v1051_v15 }
 0x125   : > { %1076 = vst.msk [vmem:[%s1773_s10 + $0x88] sm:$0xff] %vm1058_vm2, %v1043_v17 }
 0x126   : > { %v975_v2 = vpop.f32.mrf.mxu3 }
 0x127   : > { %v1016_v21 = vadd.f32 %v975_v2, %v712_v59 }
 0x128   : > { %v955_v20 = vpop.f32.mrf.mxu2  ;;  %v468_v23 = vpop.f32.mrf.mxu0 }
 0x129   : > { %v1008_v22 = vadd.f32 %v955_v20, %v692_v19  ;;  %v1052_v25 = vadd.f32 %v1768_v52, %v1016_v21  ;;  %v693_v27 = vpop.f32.mrf.mxu1 }
 0x12a   : > { %v694_v6 = vadd.f32 %v693_v27, %v468_v23 }
 0x12b   : > { %v1044_v28 = vadd.f32 %v1768_v52, %v1008_v22  ;;  %1085 = vst.msk [vmem:[%s1773_s10 + $0xd0] sm:$0xff] %vm1058_vm2, %v1052_v25 }
 0x12d   : > { %1077 = vst.msk [vmem:[%s1773_s10 + $0x90] sm:$0xff] %vm1058_vm2, %v1044_v28 }
 0x12e   : > { %v977_v10 = vpop.f32.mrf.mxu3 }
 0x12f   : > { %v1017_v32 = vadd.f32 %v977_v10, %v714_v29 }
 0x130   : > { %v957_v30 = vpop.f32.mrf.mxu2  ;;  %v471_v35 = vpop.f32.mrf.mxu0 }
 0x131   : > { %v1009_v33 = vadd.f32 %v957_v30, %v694_v6  ;;  %v1053_v36 = vadd.f32 %v1768_v52, %v1017_v32  ;;  %v696_v37 = vpop.f32.mrf.mxu1 }
 0x132   : > { %v697_v39 = vadd.f32 %v696_v37, %v471_v35 }
 0x133   : > { %v1045_v38 = vadd.f32 %v1768_v52, %v1009_v33  ;;  %1086 = vst.msk [vmem:[%s1773_s10 + $0xd8] sm:$0xff] %vm1058_vm2, %v1053_v36 }
 0x135   : > { %1078 = vst.msk [vmem:[%s1773_s10 + $0x98] sm:$0xff] %vm1058_vm2, %v1045_v38 }
 0x136   : > { %v980_v18 = vpop.f32.mrf.mxu3 }
 0x137   : > { %v1018_v43 = vadd.f32 %v980_v18, %v717_v13 }
 0x138   : > { %v960_v40 = vpop.f32.mrf.mxu2  ;;  %v473_v45 = vpop.f32.mrf.mxu0 }
 0x139   : > { %v1010_v44 = vadd.f32 %v960_v40, %v697_v39  ;;  %v1054_v46 = vadd.f32 %v1768_v52, %v1018_v43  ;;  %v698_v47 = vpop.f32.mrf.mxu1 }
 0x13a   : > { %v699_v24 = vadd.f32 %v698_v47, %v473_v45 }
 0x13b   : > { %v1046_v48 = vadd.f32 %v1768_v52, %v1010_v44  ;;  %1087 = vst.msk [vmem:[%s1773_s10 + $0xe0] sm:$0xff] %vm1058_vm2, %v1054_v46 }
 0x13d   : > { %1079 = vst.msk [vmem:[%s1773_s10 + $0xa0] sm:$0xff] %vm1058_vm2, %v1046_v48 }
 0x13e   : > { %v982_v26 = vpop.f32.mrf.mxu3 }
 0x13f   : > { %v1019_v55 = vadd.f32 %v982_v26, %v719_v53 }
 0x140   : > { %v962_v54 = vpop.f32.mrf.mxu2  ;;  %v476_v60 = vpop.f32.mrf.mxu0 }
 0x141   : > { %v1011_v56 = vadd.f32 %v962_v54, %v699_v24  ;;  %v1055_v57 = vadd.f32 %v1768_v52, %v1019_v55  ;;  %v701_v61 = vpop.f32.mrf.mxu1 }
 0x142   : > { %v702_v63 = vadd.f32 %v701_v61, %v476_v60 }
 0x143   : > { %v1047_v62 = vadd.f32 %v1768_v52, %v1011_v56  ;;  %1088 = vst.msk [vmem:[%s1773_s10 + $0xe8] sm:$0xff] %vm1058_vm2, %v1055_v57 }
 0x145   : > { %1080 = vst.msk [vmem:[%s1773_s10 + $0xa8] sm:$0xff] %vm1058_vm2, %v1047_v62 }
 0x146   : > { %v985_v34 = vpop.f32.mrf.mxu3 }
 0x147   : > { %v1020_v1 = vadd.f32 %v985_v34, %v722_v31 }
 0x148   : > { %v965_v0 = vpop.f32.mrf.mxu2  ;;  %v478_v7 = vpop.f32.mrf.mxu0 }
 0x149   : > { %v1012_v3 = vadd.f32 %v965_v0, %v702_v63  ;;  %v1056_v4 = vadd.f32 %v1768_v52, %v1020_v1  ;;  %v703_v8 = vpop.f32.mrf.mxu1 }
 0x14a   : > { %v704_v42 = vadd.f32 %v703_v8, %v478_v7 }
 0x14b   : > { %v1048_v5 = vadd.f32 %v1768_v52, %v1012_v3  ;;  %1089 = vst.msk [vmem:[%s1773_s10 + $0xf0] sm:$0xff] %vm1058_vm2, %v1056_v4 }
 0x14d   : > { %1081 = vst.msk [vmem:[%s1773_s10 + $0xb0] sm:$0xff] %vm1058_vm2, %v1048_v5 }
 0x14e   : > { %v987_v41 = vpop.f32.mrf.mxu3 }
 0x14f   : > { %v1021_v9 = vadd.f32 %v987_v41, %v724_v51 }
 0x150   : > { %v967_v58 = vpop.f32.mrf.mxu2 }
 0x151   : > { %v1013_v11 = vadd.f32 %v967_v58, %v704_v42  ;;  %v1057_v12 = vadd.f32 %v1768_v52, %v1021_v9 }
 0x153   : > { %v1049_v14 = vadd.f32 %v1768_v52, %v1013_v11  ;;  %1090 = vst.msk [vmem:[%s1773_s10 + $0xf8] sm:$0xff] %vm1058_vm2, %v1057_v12 }
 0x155   : > { %1082 = vst.msk [vmem:[%s1773_s10 + $0xb8] sm:$0xff] %vm1058_vm2, %v1049_v14 }
 0x156 PF: > { %s13_s14 = sadd.s32 1, %s1621_s14   ;;  %s1954_s12 = smov %s1617_s13 }
 0x157   : > { %p10_p5 = scmp.ge.s32.totalorder %s13_s14, 4   ;;  %s1955_s13 = smov %s1957_s15 }
 0x159   :  { %12 = sbr.rel (!%p10_p5) target bundleno = 2 (0x2), region = 67 }

</bundles_post_ra>
